<compile_context>
chip_gen: v7x
topology: tpu7x:2x2x1
jax: 0.10.0
libtpu: 0.0.40
codegen_flags: <defaults>
</compile_context>

<pallas_src>
import math
import jax
import jax.numpy as jnp
from jax.experimental import pallas as pl
from jax.experimental.pallas import tpu as pltpu

LANE = 128        # TPU lane width
H1, H2 = 52, 24   # hidden widths fixed by the module


def _round_up(n, m):
    return ((n + m - 1) // m) * m


def _cdiv(a, b):
    return (a + b - 1) // b


def classifier_kernel(x_ref, w1_ref, b1_ref, w2_ref, b2_ref, w3_ref, b3_ref, o_ref):
    # One batch tile per grid step; all three (tiny) matmuls fused, f32 accumulation.
    x = x_ref[...]
    h1 = jnp.dot(x, w1_ref[...], preferred_element_type=jnp.float32) + b1_ref[...]
    h1 = jnp.maximum(h1, 0.0)
    h2 = jnp.dot(h1.astype(w2_ref.dtype), w2_ref[...],
                 preferred_element_type=jnp.float32) + b2_ref[...]
    h2 = jnp.maximum(h2, 0.0)
    o = jnp.dot(h2.astype(w3_ref.dtype), w3_ref[...],
                preferred_element_type=jnp.float32) + b3_ref[...]
    o_ref[...] = o.astype(o_ref.dtype)


def prepare_params(params, compute_dtype=jnp.bfloat16):
    """One-time (hoisted) param prep: pad hidden dims to 128 lanes and cast.

    Weights -> compute_dtype (bf16 default: MXU-native, half the HBM/VMEM
    traffic on v6e/v7x). Biases stay f32 (added post-accumulation). Zero
    padding of hidden features is exact. x / output stay unpadded.
    """
    w1, b1, w2, b2, w3, b3 = (params[k] for k in ("w1", "b1", "w2", "b2", "w3", "b3"))
    z_dim, y_dim = w1.shape[0], w3.shape[1]
    h1p = _round_up(w1.shape[1], LANE)
    h2p = _round_up(w2.shape[1], LANE)

    def pad2(a, rows, cols):
        return jnp.pad(a, ((0, rows - a.shape[0]), (0, cols - a.shape[1])))

    return dict(
        w1=pad2(w1, z_dim, h1p).astype(compute_dtype),
        b1=pad2(b1, 1, h1p).astype(jnp.float32),
        w2=pad2(w2, h1p, h2p).astype(compute_dtype),
        b2=pad2(b2, 1, h2p).astype(jnp.float32),
        w3=pad2(w3, h2p, y_dim).astype(compute_dtype),
        b3=b3.astype(jnp.float32),
    )


def classifier_forward(x, prepared, *, block_b=4096):
    """x: [B, z_dim] f32. prepared: output of prepare_params()."""
    w1, b1, w2, b2, w3, b3 = (prepared[k] for k in ("w1", "b1", "w2", "b2", "w3", "b3"))
    compute_dtype = w1.dtype
    B, z_dim = x.shape
    assert w1.shape[0] == z_dim, "x feature dim does not match w1"
    h1p, h2p, y_dim = w1.shape[1], w2.shape[1], w3.shape[1]

    if y_dim == 0:
        # Module default y_dim=0 -> degenerate Linear(24, 0): empty output.
        return jnp.zeros((B, 0), jnp.float32)

    # Batch tiling: cap at block_b, sublane-aligned (x8), avoid the
    # round_up(B, tb) ~2x-waste trap, and give v7x's two TensorCores >= 2
    # grid steps whenever the batch is big enough for it to matter.
    steps = _cdiv(B, block_b)
    if B >= 16:
        steps = max(steps, 2)
    tb = min(_round_up(_cdiv(B, steps), 8), _round_up(B, 8))
    bp = _round_up(B, tb)
    grid = (bp // tb,)

    xd = x.astype(compute_dtype)
    if bp != B:
        xd = jnp.pad(xd, ((0, bp - B), (0, 0)))   # zero rows, sliced off below

    const = lambda i: (0, 0)  # weights/biases: same block every step -> resident

    itemsize = jnp.dtype(compute_dtype).itemsize
    flops = 2 * B * (z_dim * H1 + H1 * H2 + H2 * y_dim)
    bytes_accessed = (
        B * z_dim * itemsize                                  # x in
        + (z_dim * h1p + h1p * h2p + h2p * y_dim) * itemsize  # resident weights
        + (h1p + h2p + y_dim) * 4                             # biases
        + B * y_dim * 4                                       # out
    )

    # Scoped-VMEM hint: ~6 f32 (tb,128) activation temporaries + double-buffered
    # x/out tiles + resident weights. v5e default (16 MiB) is too small at
    # tb >= 4096; keep well under v7x's 64 MiB physical VMEM.
    vmem_need = (
        6 * tb * max(h1p, h2p) * 4
        + 2 * tb * (z_dim * itemsize + y_dim * 4)
        + (z_dim * h1p + h1p * h2p + h2p * y_dim) * itemsize
        + (h1p + h2p + y_dim) * 4
    )
    vmem_limit = int(min(56 * 2**20, max(32 * 2**20, 2 * vmem_need)))

    out = pl.pallas_call(
        classifier_kernel,
        out_shape=jax.ShapeDtypeStruct((bp, y_dim), jnp.float32),
        grid=grid,
        in_specs=[
            pl.BlockSpec((tb, z_dim), lambda i: (i, 0)),  # x: batch-tiled, lane dim = full z_dim
            pl.BlockSpec((z_dim, h1p), const),            # w1
            pl.BlockSpec((1, h1p), const),                # b1
            pl.BlockSpec((h1p, h2p), const),              # w2
            pl.BlockSpec((1, h2p), const),                # b2
            pl.BlockSpec((h2p, y_dim), const),            # w3 (lane dim = full y_dim)
            pl.BlockSpec((1, y_dim), const),              # b3
        ],
        out_specs=pl.BlockSpec((tb, y_dim), lambda i: (i, 0)),  # unpadded y_dim writeback
        compiler_params=pltpu.CompilerParams(
            dimension_semantics=("parallel",),            # batch axis -> 2 TCs on v7x
            vmem_limit_bytes=vmem_limit,
        ),
        cost_estimate=pl.CostEstimate(
            flops=flops, transcendentals=0, bytes_accessed=bytes_accessed),
    )(xd, w1, b1, w2, b2, w3, b3)

    return out[:B, :]   # only batch padding to strip; no lane slice needed


def init_linear(key, fan_in, fan_out):
    """Deterministic init mimicking PyTorch nn.Linear defaults (kaiming uniform)."""
    kw, kb = jax.random.split(key)
    bound_w = math.sqrt(1.0 / fan_in) * math.sqrt(3.0)  # kaiming_uniform(a=sqrt(5))
    w = jax.random.uniform(kw, (fan_in, fan_out), jnp.float32, -bound_w, bound_w)
    bound_b = 1.0 / math.sqrt(fan_in)
    b = jax.random.uniform(kb, (1, fan_out), jnp.float32, -bound_b, bound_b)
    return w, b


def make_params(key, z_dim, y_dim):
    k1, k2, k3 = jax.random.split(key, 3)
    w1, b1 = init_linear(k1, z_dim, H1)
    w2, b2 = init_linear(k2, H1, H2)
    w3, b3 = init_linear(k3, H2, y_dim)
    return dict(w1=w1, b1=b1, w2=w2, b2=b2, w3=w3, b3=b3)


def reference_forward(x, p):
    h1 = jnp.maximum(x @ p["w1"] + p["b1"], 0.0)
    h2 = jnp.maximum(h1 @ p["w2"] + p["b2"], 0.0)
    return h2 @ p["w3"] + p["b3"]


if __name__ == "__main__":
    # Module default is y_dim=0 (degenerate head); use a small nonzero y_dim
    # so the example produces a real classification output.
    z_dim, y_dim, batch = 10, 4, 8

    key = jax.random.PRNGKey(0)
    k_x, k_p = jax.random.split(key)
    x = jax.random.normal(k_x, (batch, z_dim), dtype=jnp.float32)
    params = make_params(k_p, z_dim, y_dim)
    ref = reference_forward(x, params)

    # f32 path: bit-tight agreement with the f32 reference.
    prep_f32 = prepare_params(params, compute_dtype=jnp.float32)
    out = jax.block_until_ready(classifier_forward(x, prep_f32))
    assert out.shape == (batch, y_dim)
    assert jnp.allclose(out, ref, atol=1e-5, rtol=1e-5), "f32 mismatch vs JAX reference"

    # Default bf16 path (halved HBM traffic on v6e/v7x; f32 accumulation kept).
    prep_bf16 = prepare_params(params)
    out_bf = jax.block_until_ready(classifier_forward(x, prep_bf16))
    assert out_bf.shape == (batch, y_dim)
    assert jnp.allclose(out_bf, ref, atol=1e-1, rtol=1e-1), "bf16 mismatch vs JAX reference"

    print("KERNEL_OK")
</pallas_src>

<mosaic_0001>
module attributes {stable_mosaic.version = 11 : i64} {
  func.func @classifier_kernel(%arg0: i32, %arg1: memref<8x10xf32, #tpu.memory_space<vmem>>, %arg2: memref<10x128xf32, #tpu.memory_space<vmem>>, %arg3: memref<1x128xf32, #tpu.memory_space<vmem>>, %arg4: memref<128x128xf32, #tpu.memory_space<vmem>>, %arg5: memref<1x128xf32, #tpu.memory_space<vmem>>, %arg6: memref<128x4xf32, #tpu.memory_space<vmem>>, %arg7: memref<1x4xf32, #tpu.memory_space<vmem>>, %arg8: memref<8x4xf32, #tpu.memory_space<vmem>>) attributes {dimension_semantics = [#tpu.dimension_semantics<parallel>], iteration_bounds = array<i64: 1>, scalar_prefetch = 0 : i64, scratch_operands = 0 : i64, tpu.core_type = #tpu.core_type<tc>, window_params = [{transform_indices = @transform_0, window_bounds = array<i64: 8, 10>}, {pipeline_mode = #tpu.pipeline_mode<synchronous>, transform_indices = @transform_1, window_bounds = array<i64: 10, 128>}, {pipeline_mode = #tpu.pipeline_mode<synchronous>, transform_indices = @transform_2, window_bounds = array<i64: 1, 128>}, {pipeline_mode = #tpu.pipeline_mode<synchronous>, transform_indices = @transform_3, window_bounds = array<i64: 128, 128>}, {pipeline_mode = #tpu.pipeline_mode<synchronous>, transform_indices = @transform_4, window_bounds = array<i64: 1, 128>}, {pipeline_mode = #tpu.pipeline_mode<synchronous>, transform_indices = @transform_5, window_bounds = array<i64: 128, 4>}, {pipeline_mode = #tpu.pipeline_mode<synchronous>, transform_indices = @transform_6, window_bounds = array<i64: 1, 4>}, {transform_indices = @transform_7, window_bounds = array<i64: 8, 4>}]} {
    %c0 = arith.constant 0 : index
    %c0_0 = arith.constant 0 : index
    %0 = vector.load %arg1[%c0, %c0_0] : memref<8x10xf32, #tpu.memory_space<vmem>>, vector<8x10xf32>
    %c0_1 = arith.constant 0 : index
    %c0_2 = arith.constant 0 : index
    %1 = vector.load %arg2[%c0_1, %c0_2] : memref<10x128xf32, #tpu.memory_space<vmem>>, vector<10x128xf32>
    %cst = arith.constant dense<0.000000e+00> : vector<8x128xf32>
    %2 = tpu.matmul %0, %1, %cst {dimension_numbers = #tpu.dot_dimension_numbers<[1], [0], [0], [1], [0, 0, 1, 1], [], []>} : vector<8x10xf32>, vector<10x128xf32>, vector<8x128xf32> -> vector<8x128xf32>
    %c0_3 = arith.constant 0 : index
    %c0_4 = arith.constant 0 : index
    %3 = vector.load %arg3[%c0_3, %c0_4] : memref<1x128xf32, #tpu.memory_space<vmem>>, vector<1x128xf32>
    %4 = vector.broadcast %3 : vector<1x128xf32> to vector<8x128xf32>
    %5 = arith.addf %2, %4 : vector<8x128xf32>
    %cst_5 = arith.constant 0.000000e+00 : f32
    %6 = vector.broadcast %cst_5 : f32 to vector<8x128xf32>
    %7 = arith.maximumf %5, %6 : vector<8x128xf32>
    %c0_6 = arith.constant 0 : index
    %c0_7 = arith.constant 0 : index
    %8 = vector.load %arg4[%c0_6, %c0_7] : memref<128x128xf32, #tpu.memory_space<vmem>>, vector<128x128xf32>
    %cst_8 = arith.constant dense<0.000000e+00> : vector<8x128xf32>
    %9 = tpu.matmul %7, %8, %cst_8 {dimension_numbers = #tpu.dot_dimension_numbers<[1], [0], [0], [1], [0, 0, 1, 1], [], []>} : vector<8x128xf32>, vector<128x128xf32>, vector<8x128xf32> -> vector<8x128xf32>
    %c0_9 = arith.constant 0 : index
    %c0_10 = arith.constant 0 : index
    %10 = vector.load %arg5[%c0_9, %c0_10] : memref<1x128xf32, #tpu.memory_space<vmem>>, vector<1x128xf32>
    %11 = vector.broadcast %10 : vector<1x128xf32> to vector<8x128xf32>
    %12 = arith.addf %9, %11 : vector<8x128xf32>
    %cst_11 = arith.constant 0.000000e+00 : f32
    %13 = vector.broadcast %cst_11 : f32 to vector<8x128xf32>
    %14 = arith.maximumf %12, %13 : vector<8x128xf32>
    %c0_12 = arith.constant 0 : index
    %c0_13 = arith.constant 0 : index
    %15 = vector.load %arg6[%c0_12, %c0_13] : memref<128x4xf32, #tpu.memory_space<vmem>>, vector<128x4xf32>
    %cst_14 = arith.constant dense<0.000000e+00> : vector<8x4xf32>
    %16 = tpu.matmul %14, %15, %cst_14 {dimension_numbers = #tpu.dot_dimension_numbers<[1], [0], [0], [1], [0, 0, 1, 1], [], []>} : vector<8x128xf32>, vector<128x4xf32>, vector<8x4xf32> -> vector<8x4xf32>
    %c0_15 = arith.constant 0 : index
    %c0_16 = arith.constant 0 : index
    %17 = vector.load %arg7[%c0_15, %c0_16] : memref<1x4xf32, #tpu.memory_space<vmem>>, vector<1x4xf32>
    %18 = vector.broadcast %17 : vector<1x4xf32> to vector<8x4xf32>
    %19 = arith.addf %16, %18 : vector<8x4xf32>
    %c0_17 = arith.constant 0 : index
    %c0_18 = arith.constant 0 : index
    %20 = vector.load %arg8[%c0_17, %c0_18] : memref<8x4xf32, #tpu.memory_space<vmem>>, vector<8x4xf32>
    tpu.vector_store %arg8[%c0_17, %c0_18], %19 {strides = array<i32>} : memref<8x4xf32, #tpu.memory_space<vmem>>, vector<8x4xf32>,
    return
  }
  func.func @transform_0(%arg0: i32) -> (i32, i32) {
    %c0_i32 = arith.constant 0 : i32
    %c0_i32_0 = arith.constant 0 : i32
    return %arg0, %c0_i32 : i32, i32
  }
  func.func @transform_1(%arg0: i32) -> (i32, i32) {
    %c0_i32 = arith.constant 0 : i32
    %c0_i32_0 = arith.constant 0 : i32
    %c0_i32_1 = arith.constant 0 : i32
    return %c0_i32, %c0_i32_0 : i32, i32
  }
  func.func @transform_2(%arg0: i32) -> (i32, i32) {
    %c0_i32 = arith.constant 0 : i32
    %c0_i32_0 = arith.constant 0 : i32
    %c0_i32_1 = arith.constant 0 : i32
    return %c0_i32, %c0_i32_0 : i32, i32
  }
  func.func @transform_3(%arg0: i32) -> (i32, i32) {
    %c0_i32 = arith.constant 0 : i32
    %c0_i32_0 = arith.constant 0 : i32
    %c0_i32_1 = arith.constant 0 : i32
    return %c0_i32, %c0_i32_0 : i32, i32
  }
  func.func @transform_4(%arg0: i32) -> (i32, i32) {
    %c0_i32 = arith.constant 0 : i32
    %c0_i32_0 = arith.constant 0 : i32
    %c0_i32_1 = arith.constant 0 : i32
    return %c0_i32, %c0_i32_0 : i32, i32
  }
  func.func @transform_5(%arg0: i32) -> (i32, i32) {
    %c0_i32 = arith.constant 0 : i32
    %c0_i32_0 = arith.constant 0 : i32
    %c0_i32_1 = arith.constant 0 : i32
    return %c0_i32, %c0_i32_0 : i32, i32
  }
  func.func @transform_6(%arg0: i32) -> (i32, i32) {
    %c0_i32 = arith.constant 0 : i32
    %c0_i32_0 = arith.constant 0 : i32
    %c0_i32_1 = arith.constant 0 : i32
    return %c0_i32, %c0_i32_0 : i32, i32
  }
  func.func @transform_7(%arg0: i32) -> (i32, i32) {
    %c0_i32 = arith.constant 0 : i32
    %c0_i32_0 = arith.constant 0 : i32
    return %arg0, %c0_i32 : i32, i32
  }
}

</mosaic_0001>

<bundles_post_ra>
// kernel: tpu_custom_call.1
= control target key start
LH: loop header
LB: loop body
LE: loop exit
PB: predicated region body
PF: predicated region fallthrough
CT: control target
= control target key end

     0   :  { %12 = vsyncpa [#allocation3], 0  ;;  %s525_s24 = smov [#allocation2]   ;;  %s715_s0 = inlined_call_operand.vmem [shape: f32[8,10], index: 0, kind: input, shape index: {}]   ;;  %s716_s1 = inlined_call_operand.hbm [shape: f32[10,128], index: 1, kind: input, shape index: {}]   ;;  %s717_s2 = inlined_call_operand.vmem [shape: f32[1,128], index: 2, kind: input, shape index: {}]   ;;  %s718_s3 = inlined_call_operand.vmem [shape: f32[128,128], index: 3, kind: input, shape index: {}]   ;;  %s719_s4 = inlined_call_operand.vmem [shape: f32[1,128], index: 4, kind: input, shape index: {}]   ;;  %s720_s5 = inlined_call_operand.vmem [shape: f32[128,4], index: 5, kind: input, shape index: {}]   ;;  %s721_s6 = inlined_call_operand.vmem [shape: f32[1,4], index: 6, kind: input, shape index: {}]   ;;  %s722_s7 = inlined_call_operand.vmem [shape: f32[8,4], index: 7, kind: output, shape index: {}]  }
   0x1   :  { %s20_s25 = sshll.u32 %s525_s24, 4  ;;  %s501_s28 = scalar_lea.hbm %s716_s1, 256  ;;  %s21_s25 = int_to_ptr.vmem [resolvable:$true] %s20_s25 }
   0x2   :  { %p502_p0 = scmp.ne.s32.totalorder %s716_s1, %s501_s28  ;;  %p505_p1 = scmp.lt.u32.totalorder %s501_s28, %s716_s1 }
   0x4   :  { %p507_p2 = pnand %p505_p1, %p502_p0 }
   0x6   :  { %510 = shalt.err (!%p507_p2)
}
   0x7   :  { %s511_s10 = scalar_lea.vmem %s21_s25, 256  ;;  %p516_p4 = scmp.lt.s32.totalorder %s21_s25, %s21_s25 }
   0x8   :  { %p512_p3 = scmp.ne.s32.totalorder %s21_s25, %s511_s10  ;;  %p517_p5 = scmp.lt.s32.totalorder %s511_s10, %s511_s10 }
   0xa   :  { %p518_p6 = por %p517_p5, %p516_p4 }
   0xc   :  { %p519_p7 = pnand %p518_p6, %p512_p3 }
   0xe   :  { %522 = shalt.err (!%p519_p7)
}
   0xf   :  { %s526_s11 = smov 128   ;;  %s527_s12 = smov 8  }
  0x10   :  { %26 = dma.hbm_to_vmem [thread:$0]  %s716_s1, 256, %s21_s25, [#allocation3], %s526_s11, %s526_s11, %s527_s12  }
  0x11   :  { %523 = dma.done.wait [#allocation3], 256  }
  0x12   :  { %524 = vsyncadd [#allocation3], 4294967040  ;;  %v528_v0 = vmov 0.0|0.0   ;;  %vm529_vm0 = vmmov 0   ;;  %v530_v1 = vmov 0.0   ;;  %vm54_vm1 = vcmask 1041408  }
  0x13   :  { %442 = vmatprep.subr.bf16.mxu0 %v528_v0  ;;  %446 = vmatprep.subr.bf16.mxu1 %v528_v0  ;;  %v41_v2 = vld [vmem:[#allocation2] sm:$0xff]  ;;  %v42_v3 = vld [vmem:[#allocation2 + $0x8] sm:$0x3]  ;;  %vm531_vm2 = vmmov 1   ;;  %v131_v7 = vld [vmem:[%s718_s3 + $0x10] sm:$0xff]  ;;  %vm50_vm4 = vcmask 80896  }
  0x14   :  { %369 = vmatprep.mubr.msk.f32.mxu0 %vm529_vm0, %v530_v1  ;;  %404 = vmatprep.mubr.msk.f32.mxu1 %vm529_vm0, %v530_v1  ;;  %vm444_vm3 = vmpackc.low %vm54_vm1, %vm531_vm2  ;;  %v443_v4 = vpack.c.bf16 %v42_v3, %v41_v2  ;;  %v129_v5 = vld [vmem:[%s718_s3] sm:$0xff]  ;;  %v130_v6 = vld [vmem:[%s718_s3 + $0x8] sm:$0xff]  ;;  %vm316_vm5 = vcmask 31744  }
  0x15   :  { %v447_v8 = vpack.c.bf16 %v130_v6, %v129_v5  ;;  %v132_v9 = vld [vmem:[%s718_s3 + $0x18] sm:$0xff]  ;;  %v40_v10 = vld [vmem:[%s715_s0] sm:$0xff]  ;;  %v134_v13 = vld [vmem:[%s718_s3 + $0x28] sm:$0xff] }
  0x16   :  { %445 = vmatpush3.bf16.msk.msra.mxu0 %vm444_vm3, %v443_v4  ;;  %v450_v11 = vpack.c.bf16 %v132_v9, %v131_v7  ;;  %v133_v12 = vld [vmem:[%s718_s3 + $0x20] sm:$0xff]  ;;  %v135_v15 = vld [vmem:[%s718_s3 + $0x30] sm:$0xff]  ;;  %v136_v16 = vld [vmem:[%s718_s3 + $0x38] sm:$0xff] }
  0x17   :  { %448 = vmatpush3.bf16.msra.mxu1 %v447_v8  ;;  %470 = vmatprep.subr.bf16.mxu0 %v528_v0  ;;  %v453_v14 = vpack.c.bf16 %v134_v13, %v133_v12  ;;  %v456_v17 = vpack.c.bf16 %v136_v16, %v135_v15  ;;  %v137_v18 = vld [vmem:[%s718_s3 + $0x40] sm:$0xff]  ;;  %v138_v19 = vld [vmem:[%s718_s3 + $0x48] sm:$0xff]  ;;  %v139_v21 = vld [vmem:[%s718_s3 + $0x50] sm:$0xff] }
  0x18   :  { %449 = vmatprep.subr.bf16.mxu1 %v528_v0  ;;  %v459_v20 = vpack.c.bf16 %v138_v19, %v137_v18  ;;  %v140_v22 = vld [vmem:[%s718_s3 + $0x58] sm:$0xff]  ;;  %v141_v24 = vld [vmem:[%s718_s3 + $0x60] sm:$0xff]  ;;  %v142_v25 = vld [vmem:[%s718_s3 + $0x68] sm:$0xff] }
  0x19   :  { %370 = vmatmul.mubr.msk.f32.vlgmr.msra.gmra.mrb[0].mxu0 %vm50_vm4, %v40_v10  ;;  %v462_v23 = vpack.c.bf16 %v140_v22, %v139_v21  ;;  %v465_v26 = vpack.c.bf16 %v142_v25, %v141_v24  ;;  %v143_v27 = vld [vmem:[%s718_s3 + $0x70] sm:$0xff]  ;;  %v144_v28 = vld [vmem:[%s718_s3 + $0x78] sm:$0xff]  ;;  %v223_v30 = vld [vmem:[%s720_s5] sm:$0xff] }
  0x1a   :  { %439 = vmatprep.mubr.msk.f32.mxu0 %vm529_vm0, %v530_v1  ;;  %v468_v29 = vpack.c.bf16 %v144_v28, %v143_v27  ;;  %v224_v31 = vld [vmem:[%s720_s5 + $0x8] sm:$0xff]  ;;  %v225_v32 = vld [vmem:[%s720_s5 + $0x10] sm:$0xff]  ;;  %v226_v34 = vld [vmem:[%s720_s5 + $0x18] sm:$0xff] }
  0x1b   :  { %451 = vmatpush3.bf16.msra.mxu1 %v450_v11  ;;  %v471_v33 = vpack.c.bf16 %v224_v31, %v223_v30  ;;  %v474_v35 = vpack.c.bf16 %v226_v34, %v225_v32  ;;  %v227_v36 = vld [vmem:[%s720_s5 + $0x20] sm:$0xff]  ;;  %v228_v37 = vld [vmem:[%s720_s5 + $0x28] sm:$0xff]  ;;  %v229_v39 = vld [vmem:[%s720_s5 + $0x30] sm:$0xff] }
  0x1c   :  { %452 = vmatprep.subr.bf16.mxu1 %v528_v0  ;;  %v477_v38 = vpack.c.bf16 %v228_v37, %v227_v36  ;;  %v230_v40 = vld [vmem:[%s720_s5 + $0x38] sm:$0xff]  ;;  %v231_v42 = vld [vmem:[%s720_s5 + $0x40] sm:$0xff]  ;;  %v232_v43 = vld [vmem:[%s720_s5 + $0x48] sm:$0xff] }
  0x1d   :  { %472 = vmatpush3.bf16.msra.mxu0 %v471_v33  ;;  %v480_v41 = vpack.c.bf16 %v230_v40, %v229_v39  ;;  %v483_v44 = vpack.c.bf16 %v232_v43, %v231_v42  ;;  %v233_v45 = vld [vmem:[%s720_s5 + $0x50] sm:$0xff]  ;;  %v234_v46 = vld [vmem:[%s720_s5 + $0x58] sm:$0xff]  ;;  %v235_v48 = vld [vmem:[%s720_s5 + $0x60] sm:$0xff] }
  0x1e   :  { %473 = vmatprep.subr.bf16.mxu0 %v528_v0  ;;  %v486_v47 = vpack.c.bf16 %v234_v46, %v233_v45  ;;  %v236_v49 = vld [vmem:[%s720_s5 + $0x68] sm:$0xff]  ;;  %v323_v51 = vld [vmem:[%s717_s2] ss:$0 sm:$0xff]  ;;  %v237_v56 = vld [vmem:[%s720_s5 + $0x70] sm:$0xff] }
  0x1f   :  { %454 = vmatpush3.bf16.msra.mxu1 %v453_v14  ;;  %v489_v50 = vpack.c.bf16 %v236_v49, %v235_v48  ;;  %v238_v57 = vld [vmem:[%s720_s5 + $0x78] sm:$0xff]  ;;  %v326_v59 = vld [vmem:[%s719_s4] ss:$0 sm:$0xff] }
  0x20   :  { %455 = vmatprep.subr.bf16.mxu1 %v528_v0  ;;  %v492_v58 = vpack.c.bf16 %v238_v57, %v237_v56 }
  0x21   :  { %475 = vmatpush3.bf16.msra.mxu0 %v474_v35 }
  0x22   :  { %476 = vmatprep.subr.bf16.mxu0 %v528_v0 }
  0x23   :  { %457 = vmatpush3.bf16.msra.mxu1 %v456_v17 }
  0x24   :  { %458 = vmatprep.subr.bf16.mxu1 %v528_v0 }
  0x25   :  { %478 = vmatpush3.bf16.msra.mxu0 %v477_v38 }
  0x26   :  { %479 = vmatprep.subr.bf16.mxu0 %v528_v0 }
  0x27   :  { %460 = vmatpush3.bf16.msra.mxu1 %v459_v20 }
  0x28   :  { %461 = vmatprep.subr.bf16.mxu1 %v528_v0 }
  0x29   :  { %481 = vmatpush3.bf16.msra.mxu0 %v480_v41 }
  0x2a   :  { %482 = vmatprep.subr.bf16.mxu0 %v528_v0 }
  0x2b   :  { %463 = vmatpush3.bf16.msra.mxu1 %v462_v23 }
  0x2c   :  { %464 = vmatprep.subr.bf16.mxu1 %v528_v0 }
  0x2d   :  { %484 = vmatpush3.bf16.msra.mxu0 %v483_v44 }
  0x2e   :  { %485 = vmatprep.subr.bf16.mxu0 %v528_v0 }
  0x2f   :  { %466 = vmatpush3.bf16.msra.mxu1 %v465_v26 }
  0x30   :  { %467 = vmatprep.subr.bf16.mxu1 %v528_v0 }
  0x31   :  { %487 = vmatpush3.bf16.msra.mxu0 %v486_v47 }
  0x32   :  { %488 = vmatprep.subr.bf16.mxu0 %v528_v0 }
  0x33   :  { %469 = vmatpush3.bf16.msra.mxu1 %v468_v29 }
  0x35   :  { %490 = vmatpush3.bf16.msra.mxu0 %v489_v50 }
  0x36   :  { %491 = vmatprep.subr.bf16.mxu0 %v528_v0  ;;  %v327_v0 = vld [vmem:[%s721_s6] ss:$0 sm:$0xff] }
  0x39   :  { %493 = vmatpush3.bf16.msra.mxu0 %v492_v58 }
  0xec   :  { %v124_v52 = vpop.f32.mrb[0].mxu0 }
  0xed   :  { %v125_v53 = vadd.f32 %v323_v51, %v124_v52  ;;  %v371_v54 = vpop.f32.mrb[1].mxu0 }
  0xef   :  { %v128_v55 = vmax.f32 %v125_v53, 0.0 }
  0xf1   :  { %405 = vmatmul.mubr.f32.vlgmr.msra.gmra.mrb[0].mxu1 %v128_v55 }
 0x1c4   :  { %v218_v60 = vpop.f32.mrb[0].mxu1 }
 0x1c5   :  { %v219_v61 = vadd.f32 %v326_v59, %v218_v60  ;;  %v406_v62 = vpop.f32.mrb[1].mxu1 }
 0x1c7   :  { %v222_v63 = vmax.f32 %v219_v61, 0.0 }
 0x1c9   :  { %440 = vmatmul.mubr.f32.vlgmr.msra.gmra.mrb[2].mxu0 %v222_v63 }
 0x29c   :  { %v312_v1 = vpop.f32.mrb[2].mxu0 }
 0x29d   :  { %v313_v2 = vadd.f32 %v327_v0, %v312_v1  ;;  %v441_v3 = vpop.f32.mrb[3].mxu0 }
 0x29f   :  { %317 = vst.msk [vmem:[%s722_s7] sm:$0xff] %vm316_vm5, %v313_v2 }
 0x2a0   :  { %322 = vsyncpa [#allocation3], 1 }

</bundles_post_ra>
